<compile_context>
chip_gen: v5e
topology: v5e:2x2
jax: 0.10.0
libtpu: 0.0.40
codegen_flags: <defaults>
</compile_context>

<pallas_src>
import jax
import jax.numpy as jnp
from jax.experimental import pallas as pl
from jax.experimental.pallas import tpu as pltpu


# Packed-parameter layout: each layer's weights occupy a row block of the
# packed (65, 32) weight operand, and its bias the same rows of the (65, 1)
# bias operand.  Row offsets are all multiples of 8 (sublane aligned).
_DIMS = ((16, 5), (32, 16), (16, 32), (1, 16))   # (out, in) per layer
_OFFS = (0, 16, 48, 64)                          # row offset of each layer
_PACK_ROWS = 65                                  # 16 + 32 + 16 + 1
_PACK_COLS = 32                                  # max fan_in


def _mlp_kernel(x_ref, w_ref, b_ref, o_ref):
    """Fused 4-layer MLP on one lane-tile of the batch.

    x_ref: (5, tile_n)   w_ref: (65, 32) packed   b_ref: (65, 1) packed
    o_ref: (1, tile_n)
    """
    x = x_ref[...]                                     # (5, tile_n)

    def layer(h, idx, relu):
        off = _OFFS[idx]
        out_d, in_d = _DIMS[idx]
        w = w_ref[off:off + out_d, 0:in_d]             # (out, in)
        b = b_ref[off:off + out_d, :]                  # (out, 1) broadcasts on lanes
        h = jnp.dot(w, h, preferred_element_type=jnp.float32) + b
        return jnp.maximum(h, 0.0) if relu else h

    h = layer(x, 0, True)       # (16, tile_n)
    h = layer(h, 1, True)       # (32, tile_n)
    h = layer(h, 2, True)       # (16, tile_n)
    h = layer(h, 3, False)      # (1,  tile_n)
    o_ref[...] = h.astype(o_ref.dtype)


def pack_params(params):
    """Pack PyTorch-convention weights (out, in) and biases (out,) into two operands."""
    w_packed = jnp.zeros((_PACK_ROWS, _PACK_COLS), jnp.float32)
    b_packed = jnp.zeros((_PACK_ROWS, 1), jnp.float32)
    for idx, off in enumerate(_OFFS):
        w = params[f"w{idx + 1}"].astype(jnp.float32)     # (out, in)
        b = params[f"b{idx + 1}"].astype(jnp.float32)     # (out,)
        out_d, in_d = w.shape
        w_packed = w_packed.at[off:off + out_d, :in_d].set(w)
        b_packed = b_packed.at[off:off + out_d, 0].set(b)
    return w_packed, b_packed


def static_sinr_forward(x, params, *, tile_n=2048):
    """x: (N, 5) float32.  Returns (N, 1), matching StaticSINRModel.forward."""
    N, d_in = x.shape
    assert d_in == 5

    # Lane-dense tiling: batch padded to a multiple of 128 lanes, tile capped
    # at tile_n, batch then padded to a whole number of tiles.
    n128 = ((N + 127) // 128) * 128
    tile = max(128, (min(tile_n, n128) // 128) * 128)
    n_pad = ((N + tile - 1) // tile) * tile
    grid = (n_pad // tile,)

    # Batch on the lane axis: (N, 5) -> (5, N_pad).  Zero-padded columns give
    # bias-propagated garbage that is sliced off below (columns are independent).
    xt = jnp.zeros((5, n_pad), x.dtype).at[:, :N].set(x.T)

    w_packed, b_packed = pack_params(params)

    out = pl.pallas_call(
        _mlp_kernel,
        out_shape=jax.ShapeDtypeStruct((1, n_pad), x.dtype),
        grid_spec=pl.GridSpec(
            grid=grid,
            in_specs=[
                pl.BlockSpec((5, tile), lambda i: (0, i)),                    # batch tile
                pl.BlockSpec((_PACK_ROWS, _PACK_COLS), lambda i: (0, 0)),     # packed W (resident)
                pl.BlockSpec((_PACK_ROWS, 1), lambda i: (0, 0)),              # packed b (resident)
            ],
            out_specs=pl.BlockSpec((1, tile), lambda i: (0, i)),              # lane-dense output
        ),
        compiler_params=pltpu.CompilerParams(
            dimension_semantics=("parallel",)),   # v7x: shards grid steps across 2 TCs
    )(xt, w_packed, b_packed)

    return out[0, :N].reshape(N, 1)


def init_params(key):
    """Deterministic init mimicking torch.nn.Linear default (uniform +-1/sqrt(fan_in))."""
    params = {}
    for idx, (out_d, in_d) in enumerate(_DIMS, start=1):
        key, kw, kb = jax.random.split(key, 3)
        bound = 1.0 / (in_d ** 0.5)
        params[f"w{idx}"] = jax.random.uniform(kw, (out_d, in_d), jnp.float32, -bound, bound)
        params[f"b{idx}"] = jax.random.uniform(kb, (out_d,), jnp.float32, -bound, bound)
    return params


def reference_forward(x, params):
    h = jnp.maximum(x @ params["w1"].T + params["b1"], 0.0)
    h = jnp.maximum(h @ params["w2"].T + params["b2"], 0.0)
    h = jnp.maximum(h @ params["w3"].T + params["b3"], 0.0)
    return h @ params["w4"].T + params["b4"]


if __name__ == "__main__":
    key = jax.random.PRNGKey(0)
    kx, kp = jax.random.split(key)

    N = 200  # deliberately not a multiple of 128 to exercise the padding path
    x = jax.random.normal(kx, (N, 5), jnp.float32)
    params = init_params(kp)

    # Small tile here so the grid has >1 step at this tiny demo size; the
    # production default (tile_n=2048) amortises per-step overhead at large N.
    out = static_sinr_forward(x, params, tile_n=128)
    out = jax.block_until_ready(out)

    ref = reference_forward(x, params)
    assert out.shape == (N, 1)
    assert jnp.allclose(out, ref, atol=1e-5, rtol=1e-5), "mismatch vs reference"

    print("KERNEL_OK")
</pallas_src>

<mosaic_0001>
module attributes {stable_mosaic.version = 11 : i64} {
  func.func @_mlp_kernel(%arg0: i32, %arg1: memref<5x128xf32, #tpu.memory_space<vmem>>, %arg2: memref<65x32xf32, #tpu.memory_space<vmem>>, %arg3: memref<65x1xf32, #tpu.memory_space<vmem>>, %arg4: memref<1x128xf32, #tpu.memory_space<vmem>>) attributes {dimension_semantics = [#tpu.dimension_semantics<parallel>], iteration_bounds = array<i64: 2>, scalar_prefetch = 0 : i64, scratch_operands = 0 : i64, tpu.core_type = #tpu.core_type<tc>, window_params = [{transform_indices = @transform_0, window_bounds = array<i64: 5, 128>}, {pipeline_mode = #tpu.pipeline_mode<synchronous>, transform_indices = @transform_1, window_bounds = array<i64: 65, 32>}, {pipeline_mode = #tpu.pipeline_mode<synchronous>, transform_indices = @transform_2, window_bounds = array<i64: 65, 1>}, {transform_indices = @transform_3, window_bounds = array<i64: 1, 128>}]} {
    %c0 = arith.constant 0 : index
    %c0_0 = arith.constant 0 : index
    %0 = vector.load %arg1[%c0, %c0_0] : memref<5x128xf32, #tpu.memory_space<vmem>>, vector<5x128xf32>
    %c0_1 = arith.constant 0 : index
    %c0_2 = arith.constant 0 : index
    %1 = vector.load %arg2[%c0_1, %c0_2] : memref<65x32xf32, #tpu.memory_space<vmem>>, vector<16x5xf32>
    %c0_3 = arith.constant 0 : index
    %c0_4 = arith.constant 0 : index
    %2 = vector.load %arg3[%c0_3, %c0_4] : memref<65x1xf32, #tpu.memory_space<vmem>>, vector<16x1xf32>
    %cst = arith.constant dense<0.000000e+00> : vector<16x128xf32>
    %3 = tpu.matmul %1, %0, %cst {dimension_numbers = #tpu.dot_dimension_numbers<[1], [0], [0], [1], [0, 0, 1, 1], [], []>} : vector<16x5xf32>, vector<5x128xf32>, vector<16x128xf32> -> vector<16x128xf32>
    %4 = vector.broadcast %2 : vector<16x1xf32> to vector<16x128xf32>
    %5 = arith.addf %3, %4 : vector<16x128xf32>
    %cst_5 = arith.constant 0.000000e+00 : f32
    %6 = vector.broadcast %cst_5 : f32 to vector<16x128xf32>
    %7 = arith.maximumf %5, %6 : vector<16x128xf32>
    %c16 = arith.constant 16 : index
    %c0_6 = arith.constant 0 : index
    %8 = vector.load %arg2[%c16, %c0_6] : memref<65x32xf32, #tpu.memory_space<vmem>>, vector<32x16xf32>
    %c16_7 = arith.constant 16 : index
    %c0_8 = arith.constant 0 : index
    %9 = vector.load %arg3[%c16_7, %c0_8] : memref<65x1xf32, #tpu.memory_space<vmem>>, vector<32x1xf32>
    %cst_9 = arith.constant dense<0.000000e+00> : vector<32x128xf32>
    %10 = tpu.matmul %8, %7, %cst_9 {dimension_numbers = #tpu.dot_dimension_numbers<[1], [0], [0], [1], [0, 0, 1, 1], [], []>} : vector<32x16xf32>, vector<16x128xf32>, vector<32x128xf32> -> vector<32x128xf32>
    %11 = vector.broadcast %9 : vector<32x1xf32> to vector<32x128xf32>
    %12 = arith.addf %10, %11 : vector<32x128xf32>
    %cst_10 = arith.constant 0.000000e+00 : f32
    %13 = vector.broadcast %cst_10 : f32 to vector<32x128xf32>
    %14 = arith.maximumf %12, %13 : vector<32x128xf32>
    %c48 = arith.constant 48 : index
    %c0_11 = arith.constant 0 : index
    %15 = vector.load %arg2[%c48, %c0_11] : memref<65x32xf32, #tpu.memory_space<vmem>>, vector<16x32xf32>
    %c48_12 = arith.constant 48 : index
    %c0_13 = arith.constant 0 : index
    %16 = vector.load %arg3[%c48_12, %c0_13] : memref<65x1xf32, #tpu.memory_space<vmem>>, vector<16x1xf32>
    %cst_14 = arith.constant dense<0.000000e+00> : vector<16x128xf32>
    %17 = tpu.matmul %15, %14, %cst_14 {dimension_numbers = #tpu.dot_dimension_numbers<[1], [0], [0], [1], [0, 0, 1, 1], [], []>} : vector<16x32xf32>, vector<32x128xf32>, vector<16x128xf32> -> vector<16x128xf32>
    %18 = vector.broadcast %16 : vector<16x1xf32> to vector<16x128xf32>
    %19 = arith.addf %17, %18 : vector<16x128xf32>
    %cst_15 = arith.constant 0.000000e+00 : f32
    %20 = vector.broadcast %cst_15 : f32 to vector<16x128xf32>
    %21 = arith.maximumf %19, %20 : vector<16x128xf32>
    %c64 = arith.constant 64 : index
    %c0_16 = arith.constant 0 : index
    %22 = vector.load %arg2[%c64, %c0_16] : memref<65x32xf32, #tpu.memory_space<vmem>>, vector<1x16xf32>
    %c64_17 = arith.constant 64 : index
    %c0_18 = arith.constant 0 : index
    %23 = vector.load %arg3[%c64_17, %c0_18] : memref<65x1xf32, #tpu.memory_space<vmem>>, vector<1x1xf32>
    %cst_19 = arith.constant dense<0.000000e+00> : vector<1x128xf32>
    %24 = tpu.matmul %22, %21, %cst_19 {dimension_numbers = #tpu.dot_dimension_numbers<[1], [0], [0], [1], [0, 0, 1, 1], [], []>} : vector<1x16xf32>, vector<16x128xf32>, vector<1x128xf32> -> vector<1x128xf32>
    %25 = vector.broadcast %23 : vector<1x1xf32> to vector<1x128xf32>
    %26 = arith.addf %24, %25 : vector<1x128xf32>
    %c0_20 = arith.constant 0 : index
    %c0_21 = arith.constant 0 : index
    %27 = vector.load %arg4[%c0_20, %c0_21] : memref<1x128xf32, #tpu.memory_space<vmem>>, vector<1x128xf32>
    tpu.vector_store %arg4[%c0_20, %c0_21], %26 {strides = array<i32>} : memref<1x128xf32, #tpu.memory_space<vmem>>, vector<1x128xf32>,
    return
  }
  func.func @transform_0(%arg0: i32) -> (i32, i32) {
    %c0_i32 = arith.constant 0 : i32
    %c0_i32_0 = arith.constant 0 : i32
    return %c0_i32, %arg0 : i32, i32
  }
  func.func @transform_1(%arg0: i32) -> (i32, i32) {
    %c0_i32 = arith.constant 0 : i32
    %c0_i32_0 = arith.constant 0 : i32
    %c0_i32_1 = arith.constant 0 : i32
    return %c0_i32, %c0_i32_0 : i32, i32
  }
  func.func @transform_2(%arg0: i32) -> (i32, i32) {
    %c0_i32 = arith.constant 0 : i32
    %c0_i32_0 = arith.constant 0 : i32
    %c0_i32_1 = arith.constant 0 : i32
    return %c0_i32, %c0_i32_0 : i32, i32
  }
  func.func @transform_3(%arg0: i32) -> (i32, i32) {
    %c0_i32 = arith.constant 0 : i32
    %c0_i32_0 = arith.constant 0 : i32
    return %c0_i32, %arg0 : i32, i32
  }
}

</mosaic_0001>

<bundles_post_ra>
// kernel: tpu_custom_call.1
= control target key start
LH: loop header
LB: loop body
LE: loop exit
PB: predicated region body
PF: predicated region fallthrough
CT: control target
= control target key end

     0   :  { %8 = vsyncpa [#allocation3], 0  ;;  %s726_s0 = inlined_call_operand.vmem [shape: f32[5,256], index: 0, kind: input, shape index: {}]   ;;  %s727_s1 = inlined_call_operand.vmem [shape: f32[65,32], index: 1, kind: input, shape index: {}]   ;;  %s728_s2 = inlined_call_operand.vmem [shape: f32[65,1], index: 2, kind: input, shape index: {}]   ;;  %s729_s3 = inlined_call_operand.hbm [shape: f32[1,256], index: 3, kind: output, shape index: {}]  }
   0x1   :  { %10 = vsyncpa [#allocation3 + $0x1], 0  ;;  %s582_s12 = smov 0   ;;  %s584_s13 = smov 0  }
   0x2   :  { %s586_s14 = smov 0   ;;  %s588_s15 = smov 0  }
   0x3 LB: > { %s603_s16 = sadd.s32 4294967295, %s559_s15   ;;  %s435_s17 = sadd.s32 4294967294, %s559_s15   ;;  %s559_s15 = sphi %s588_s15, %s735_s15   ;;  %s555_s14 = sphi %s586_s14, %s734_s14   ;;  %s551_s13 = sphi %s584_s13, %s733_s13   ;;  %s547_s12 = sphi %s582_s12, %s732_s12  }
   0x4   : > { %s607_s18 = sadd.s32 1, %s559_s15   ;;  %s91_s19 = sadd.s32 1, %s555_s14 }
   0x5   : > { %s88_s20 = ssub.s32 %s559_s15, %s607_s18  ;;  %p101_p0 = scmp.ne.s32.totalorder %s555_s14, %s551_s13 }
   0x6   : > { %p89_p1 = scmp.eq.s32.totalorder %s88_s20, 0  ;;  %p102_p2 = scmp.eq.s32.totalorder %s603_s16, 1 }
   0x7   : > { %p107_p3 = scmp.ne.s32.totalorder %s551_s13, %s547_s12  ;;  %p108_p4 = scmp.eq.s32.totalorder %s435_s17, 1 }
   0x8   : > { %s618_s21 = scalar_select %p89_p1, %s555_s14, %s91_s19  }
   0x9   : > { %p620_p5 = por %p102_p2, %p101_p0  ;;  %p624_p6 = por %p108_p4, %p107_p3 }
   0xa   : > { %p438_p7 = scmp.ge.s32.totalorder %s559_s15, 1  ;;  %p139_p8 = scmp.lt.s32.totalorder %s559_s15, 3 }
   0xc   : > { %p140_p9 = pnand %p438_p7, %p139_p8 }
   0xd   : > { %p161_p10 = scmp.lt.s32.totalorder (!%p140_p9), %s603_s16, 1  ;;  %s159_s29 = sand.u32 (!%p140_p9), 1, %s551_s13  }
   0xe   : > { %143 = sbr.rel (%p140_p9) target bundleno = 601 (0x259), region = 32  ;;  %s376_s5 = scalar_lea.hbm (!%p140_p9), %s729_s3, %s603_s16 }
   0xf   : > { %s160_s6 = scalar_lea.vmem (!%p140_p9), [#allocation2], %s159_s29  ;;  %s380_s8 = sshll.u32 (!%p140_p9), %s376_s5, 4  ;;  %s381_s8 = int_to_ptr.hbm [resolvable:$true] %s380_s8 }
  0x10   : > { %s378_s7 = sshll.u32 (!%p140_p9), %s160_s6, 4  ;;  %s368_s9 = scalar_lea.sflag (!%p140_p9), [#allocation3], %s159_s29  ;;  %s379_s7 = int_to_ptr.vmem [resolvable:$true] %s378_s7 }
  0x11   : > { %s511_s10 = sshra.s32 (!%p140_p9), %s381_s8, 4  ;;  %s512_s10 = int_to_ptr.hbm [resolvable:$true] %s511_s10 }
  0x12   : > { %s513_s11 = scalar_lea.hbm (!%p140_p9), %s512_s10, 1  ;;  %p518_p0 = scmp.lt.s32.totalorder (!%p140_p9), %s512_s10, %s729_s3 }
  0x13   : > { %v169_v0 = vld [vmem:[%s728_s2 + $0x8] sm:$0xff]  ;;  %v561_v1 = vmov 0   ;;  %s162_s26 = scalar_select %p161_p10, %s603_s16, 1  ;;  %vm187_vm0 = vcmask 1044480   ;;  %v166_v2 = vld [vmem:[%s727_s1] sm:$0xff]  ;;  %vm180_vm1 = vcmask 39936  }
  0x14   : > { %494 = vset.pattern.permute.xlu0 %v561_v1  ;;  %495 = vset.pattern.permute.xlu1 %v561_v1  ;;  %v168_v4 = vld [vmem:[%s728_s2] sm:$0xff]  ;;  %v167_v5 = vld [vmem:[%s727_s1 + $0x8] sm:$0xff]  ;;  %v293_v6 = vld [vmem:[%s728_s2 + $0x38] sm:$0xff]  ;;  %vm244_vm2 = vcmask 130048   ;;  %vm304_vm3 = vcmask 261120   ;;  %p514_p11 = scmp.ne.s32.totalorder %s512_s10, %s513_s11  ;;  %s517_s16 = scalar_lea.hbm %s729_s3, 2 }
  0x15   : > { %177 = vperm.xlu0 %494, %v169_v0   ;;  %496 = vset.pattern.permute.xlu2 %v561_v1  ;;  %s439_s27 = sshll.u32 %s162_s26, 3  ;;  %v223_v7 = vld [vmem:[%s728_s2 + $0x28] sm:$0xff]  ;;  %v222_v8 = vld [vmem:[%s728_s2 + $0x20] sm:$0xff]  ;;  %v292_v11 = vld [vmem:[%s728_s2 + $0x30] sm:$0xff]  ;;  %p519_p1 = scmp.lt.s32.totalorder %s517_s16, %s513_s11 }
  0x16   : > { %s164_s30 = scalar_lea.vmem %s726_s0, %s439_s27  ;;  %241 = vperm.xlu1 %495, %v223_v7   ;;  %v221_v12 = vld [vmem:[%s728_s2 + $0x18] sm:$0xff]  ;;  %v220_v13 = vld [vmem:[%s728_s2 + $0x10] sm:$0xff]  ;;  %v219_v21 = vld [vmem:[%s727_s1 + $0x28] sm:$0xff]  ;;  %p515_p12 = pnand %p514_p11, %p620_p5 }
  0x17   : > { %v165_v3 = vld [vmem:[%s164_s30] sm:$0x1f]  ;;  %231 = vperm.xlu2 %496, %v221_v12   ;;  %v216_v20 = vld [vmem:[%s727_s1 + $0x10] sm:$0xff]  ;;  %v217_v23 = vld [vmem:[%s727_s1 + $0x18] sm:$0xff]  ;;  %p520_p2 = por %p519_p1, %p518_p0 }
  0x18   : > { %440 = vmatpush.msk.msra.mxu0 %vm187_vm0, %v165_v3  ;;  %v337_v22 = vld [vmem:[%s728_s2 + $0x40] sm:$0x1]  ;;  %v290_v41 = vld [vmem:[%s727_s1 + $0x30] sm:$0xff]  ;;  %v291_v42 = vld [vmem:[%s727_s1 + $0x38] sm:$0xff]  ;;  %p516_p13 = pneg %p515_p12 }
  0x19   : > { %441 = vmatmul.msk.f32.vlgmr.msra.gmra.mxu0 %vm180_vm1, %v166_v2  ;;  %v218_v24 = vld [vmem:[%s727_s1 + $0x20] sm:$0xff] }
  0x1a   : > { %v336_v51 = vld [vmem:[%s727_s1 + $0x40] sm:$0x1]  ;;  %p521_p3 = pnand %p520_p2, %p516_p13 }
  0x1d   : > { %172 = vperm.xlu0 %494, %v168_v4  }
  0x1e   : > { %236 = vperm.xlu1 %495, %v222_v8  }
  0x1f   : > { %226 = vperm.xlu2 %496, %v220_v13  }
  0x21   : > { %442 = vmatmul.msk.f32.gmra.mxu0 %vm180_vm1, %v167_v5 }
  0x25   : > { %301 = vperm.xlu0 %494, %v293_v6  }
  0x26   : > { %296 = vperm.xlu1 %495, %v292_v11  }
  0x27   : > { %340 = vperm.xlu2 %496, %v337_v22  }
  0x71   : > { %v232_v26 = vpop.permute.xlu2 %231 }
  0x79   : > { %v227_v32 = vpop.permute.xlu2 %226 }
  0x81   : > { %v341_v52 = vpop.permute.xlu2 %340 }
  0x87   : > { %v178_v9 = vpop.permute.xlu0 %177 }
  0x88   : > { %v242_v27 = vpop.permute.xlu1 %241 }
  0x8f   : > { %v173_v14 = vpop.permute.xlu0 %172 }
  0x90   : > { %v237_v33 = vpop.permute.xlu1 %236 }
  0x96   : > { %v208_v10 = vpop.f32.mrf.mxu0 }
  0x97   : > { %v209_v16 = vadd.f32 %v208_v10, %v173_v14  ;;  %v302_v44 = vpop.permute.xlu0 %301 }
  0x98   : > { %v297_v45 = vpop.permute.xlu1 %296 }
  0x99   : > { %v214_v19 = vmax.f32 %v209_v16, 0.0 }
  0x9e   : > { %v211_v15 = vpop.f32.mrf.mxu0 }
  0x9f   : > { %v212_v17 = vadd.f32 %v211_v15, %v178_v9 }
  0xa1   : > { %v215_v18 = vmax.f32 %v212_v17, 0.0 }
  0xa3   : > { %271 = vmatpush.msra.mxu1 %v215_v18  ;;  %452 = vmatpush.msra.mxu3 %v215_v18 }
  0xa5   : > { %272 = vmatpush.msra.mxu1 %v214_v19  ;;  %453 = vmatpush.msra.mxu3 %v214_v19 }
  0xa6   : > { %443 = vmatmul.msk.f32.vlgmr.msra.gmra.mxu1 %vm244_vm2, %v216_v20  ;;  %446 = vmatmul.msk.f32.vlgmr.msra.gmra.mxu3 %vm244_vm2, %v219_v21 }
  0xae   : > { %444 = vmatmul.msk.f32.gmra.mxu1 %vm244_vm2, %v217_v23 }
  0xb6   : > { %445 = vmatmul.msk.f32.gmra.mxu1 %vm244_vm2, %v218_v24 }
 0x123   : > { %v274_v25 = vpop.f32.mrf.mxu1 }
 0x124   : > { %v275_v37 = vadd.f32 %v274_v25, %v227_v32 }
 0x126   : > { %v286_v40 = vmax.f32 %v275_v37, 0.0 }
 0x129   : > { %v283_v28 = vpop.f32.mrf.mxu3 }
 0x12a   : > { %v284_v29 = vadd.f32 %v283_v28, %v242_v27 }
 0x12b   : > { %v277_v30 = vpop.f32.mrf.mxu1 }
 0x12c   : > { %v289_v31 = vmax.f32 %v284_v29, 0.0  ;;  %v278_v35 = vadd.f32 %v277_v30, %v232_v26 }
 0x12e   : > { %323 = vmatpush.msra.mxu2 %v289_v31  ;;  %v287_v39 = vmax.f32 %v278_v35, 0.0 }
 0x133   : > { %v280_v34 = vpop.f32.mrf.mxu1 }
 0x134   : > { %v281_v36 = vadd.f32 %v280_v34, %v237_v33 }
 0x136   : > { %v288_v38 = vmax.f32 %v281_v36, 0.0 }
 0x138   : > { %324 = vmatpush.msra.mxu2 %v288_v38 }
 0x13a   : > { %325 = vmatpush.msra.mxu2 %v287_v39 }
 0x13c   : > { %326 = vmatpush.msra.mxu2 %v286_v40 }
 0x13d   : > { %447 = vmatmul.msk.f32.vlgmr.msra.gmra.mxu2 %vm304_vm3, %v290_v41 }
 0x145   : > { %448 = vmatmul.msk.f32.gmra.mxu2 %vm304_vm3, %v291_v42 }
 0x1c0   : > { %v328_v43 = vpop.f32.mrf.mxu2 }
 0x1c1   : > { %v329_v47 = vadd.f32 %v328_v43, %v297_v45 }
 0x1c3   : > { %v334_v50 = vmax.f32 %v329_v47, 0.0 }
 0x1c8   : > { %v331_v46 = vpop.f32.mrf.mxu2 }
 0x1c9   : > { %v332_v48 = vadd.f32 %v331_v46, %v302_v44 }
 0x1cb   : > { %v335_v49 = vmax.f32 %v332_v48, 0.0 }
 0x1cd   : > { %360 = vmatpush.msrb.mxu3 %v335_v49 }
 0x1cf   : > { %361 = vmatpush.msrb.mxu3 %v334_v50 }
 0x1d0   : > { %449 = vmatmul.msk.f32.vlgmr.msrb.gmra.mxu3 %vm244_vm2, %v336_v51 }
 0x253   : > { %v363_v53 = vpop.f32.mrf.mxu3 }
 0x254   : > { %v364_v54 = vadd.f32 %v363_v53, %v341_v52 }
 0x256   : > { %366 = vst [vmem:[%s160_s6] sm:$0x1] %v364_v54 }
 0x257   : > { %524 = shalt.err (!%p521_p3)
}
 0x258   : > { %454 = dma.vmem_to_hbm [thread:$0]  (%p620_p5), %s379_s7, 16, %s381_s8, %s368_s9  }
 0x259 PF: > { %p460_p4 = scmp.ge.s32.totalorder %s559_s15, 2  ;;  %s392_s25 = sand.u32 1, %s547_s12  }
 0x25a   : > { %s393_s26 = scalar_lea.sflag [#allocation3], %s392_s25 }
 0x25b   : > { %p457_p7 = pnand %p460_p4, %p624_p6 }
 0x25d   : > { %p458_p8 = pneg %p457_p7 }
 0x25f   : > { %542 = dma.done.wait (%p458_p8), %s393_s26, 16  }
 0x260   : > { %544 = vsyncadd (%p458_p8), %s393_s26, 4294967280  ;;  %p13_p9 = scmp.ge.s32.totalorder %s607_s18, 4   ;;  %s732_s12 = smov %s551_s13 }
 0x261   : > { %s733_s13 = smov %s555_s14  ;;  %s734_s14 = smov %s618_s21 }
 0x262   : > { %s735_s15 = smov %s607_s18  ;;  %15 = sbr.rel (!%p13_p9) target bundleno = 3 (0x3), region = 67 }
 0x267   :  { %398 = vsyncpa [#allocation3], 1 }
 0x268   :  { %400 = vsyncpa [#allocation3 + $0x1], 1 }

</bundles_post_ra>
